<compile_context>
chip_gen: v5e
topology: v5e:2x2
jax: 0.10.0
libtpu: 0.0.40
codegen_flags: <defaults>
</compile_context>

<pallas_src>
import functools
import math

import jax
import jax.numpy as jnp
from jax.experimental import pallas as pl
from jax.experimental.pallas import tpu as pltpu

EPS_LN = 1e-12                                   # espnet LayerNorm eps
NEG_INF = float(jnp.finfo(jnp.float32).min)      # masked_fill value in MHA


# ----------------------------- Pallas kernels ------------------------------

def _linear_kernel(a_ref, w_ref, b_ref, o_ref, *, relu):
    # bf16 MXU operands, f32 accumulation.
    a = a_ref[...].astype(jnp.bfloat16)
    y = jnp.dot(a, w_ref[...], preferred_element_type=jnp.float32)
    y = y + b_ref[...]
    if relu:
        y = jnp.maximum(y, 0.0)
    o_ref[...] = y


def pallas_linear(a, w, b, relu=False, block_m=256):
    """(M,K)@(K,N)+b with optional ReLU, tiled over M for pipelining."""
    M, K = a.shape
    N = w.shape[1]
    # M-tile: 256 rows (8-aligned) when large, otherwise the full (small) M.
    tm = block_m if M >= block_m else M
    return pl.pallas_call(
        functools.partial(_linear_kernel, relu=relu),
        grid=(pl.cdiv(M, tm),),
        in_specs=[
            pl.BlockSpec((tm, K), lambda i: (i, 0)),
            pl.BlockSpec((K, N), lambda i: (0, 0)),
            pl.BlockSpec((1, N), lambda i: (0, 0)),
        ],
        out_specs=pl.BlockSpec((tm, N), lambda i: (i, 0)),
        out_shape=jax.ShapeDtypeStruct((M, N), jnp.float32),
        compiler_params=pltpu.CompilerParams(dimension_semantics=("parallel",)),
    )(a.astype(jnp.float32), w.astype(jnp.bfloat16),
      b.reshape(1, -1).astype(jnp.float32))


def _layernorm(x, g, b):
    mu = jnp.mean(x, axis=-1, keepdims=True)
    var = jnp.mean((x - mu) ** 2, axis=-1, keepdims=True)
    return (x - mu) * jax.lax.rsqrt(var + EPS_LN) * g + b


def _encoder_layer_kernel(x_ref, m_ref, pe_ref,
                          wqkv_ref, bqkv_ref, wo_ref, bo_ref,
                          w1_ref, b1_ref, w2_ref, b2_ref,
                          g1_ref, be1_ref, g2_ref, be2_ref,
                          gf_ref, bf_ref,
                          o_ref, *, n_head, add_pe, final_ln):
    """One StochasticEncoderLayer (death_rate=0) for one batch element.

    normalize_before=True, concat_after=False, dropout=identity (eval).
    Optionally fuses the positional-encoding add (first layer) and the
    final after_norm LayerNorm (last layer).
    """
    x = x_ref[0]                      # (T, D) f32
    if add_pe:
        x = x + pe_ref[0]             # x*sqrt(D) already folded into embed W/b
    m = m_ref[0]                      # (1, T)  1.0 = keep, 0.0 = pad
    keep = (m > 0.0)[None]            # (1, 1, T), hoisted out of attention
    D = x.shape[-1]
    dk = D // n_head
    scale = 1.0 / math.sqrt(dk)

    # --- self-attention sub-layer (pre-norm) ---
    xn = _layernorm(x, g1_ref[...], be1_ref[...])
    # fused Q/K/V projection: one (T,D)@(D,3D) bf16 matmul, f32 accumulation
    qkv = jnp.dot(xn.astype(jnp.bfloat16), wqkv_ref[...],
                  preferred_element_type=jnp.float32) + bqkv_ref[...]
    q = qkv[:, :D] * scale
    k = qkv[:, D:2 * D]
    v = qkv[:, 2 * D:]

    # head-batched layout (H, T, dk)
    qh = jnp.stack([q[:, h * dk:(h + 1) * dk] for h in range(n_head)],
                   axis=0).astype(jnp.bfloat16)
    kh = jnp.stack([k[:, h * dk:(h + 1) * dk] for h in range(n_head)],
                   axis=0).astype(jnp.bfloat16)
    vh = jnp.stack([v[:, h * dk:(h + 1) * dk] for h in range(n_head)],
                   axis=0).astype(jnp.bfloat16)

    # batched scores over the head axis: (H, T, T), f32
    s = jnp.einsum('hqd,hkd->hqk', qh, kh,
                   preferred_element_type=jnp.float32)
    s = jnp.where(keep, s, NEG_INF)                  # masking in f32
    s = s - jnp.max(s, axis=-1, keepdims=True)
    e = jnp.exp(s)
    p = e * pl.reciprocal(jnp.sum(e, axis=-1, keepdims=True), approx=True)
    p = jnp.where(keep, p, 0.0)

    # batched context: (H, T, dk)
    ctx = jnp.einsum('hqk,hkd->hqd', p.astype(jnp.bfloat16), vh,
                     preferred_element_type=jnp.float32)
    # concat heads -> (T, D), single output projection (T,D)@(D,D)
    ctx_flat = jnp.concatenate([ctx[h] for h in range(n_head)], axis=-1)
    att = jnp.dot(ctx_flat.astype(jnp.bfloat16), wo_ref[...],
                  preferred_element_type=jnp.float32) + bo_ref[...]
    x = x + att                        # residual

    # --- position-wise feed-forward sub-layer (pre-norm) ---
    xn2 = _layernorm(x, g2_ref[...], be2_ref[...])
    hmid = jnp.dot(xn2.astype(jnp.bfloat16), w1_ref[...],
                   preferred_element_type=jnp.float32) + b1_ref[...]
    hmid = jnp.maximum(hmid, 0.0)
    ff = jnp.dot(hmid.astype(jnp.bfloat16), w2_ref[...],
                 preferred_element_type=jnp.float32) + b2_ref[...]
    x = x + ff

    # --- fused final after_norm on the last layer ---
    if final_ln:
        x = _layernorm(x, gf_ref[...], bf_ref[...])

    o_ref[0] = x


def pallas_encoder_layer(x, mask_f, pe, lp, after_g, after_b,
                         n_head, add_pe, final_ln):
    B, T, D = x.shape
    U = lp["w1"].shape[1]

    def fs(shape):
        return pl.BlockSpec(shape, lambda b: (0,) * len(shape))

    in_specs = [
        pl.BlockSpec((1, T, D), lambda b: (b, 0, 0)),     # x
        pl.BlockSpec((1, 1, T), lambda b: (b, 0, 0)),     # mask
        fs((1, T, D)),                                    # positional encoding
        fs((D, 3 * D)), fs((1, 3 * D)),                   # fused wqkv, bqkv
        fs((D, D)), fs((1, D)),                           # wo, bo
        fs((D, U)), fs((1, U)),                           # ffn w1, b1
        fs((U, D)), fs((1, D)),                           # ffn w2, b2
        fs((1, D)), fs((1, D)),                           # norm1 gamma/beta
        fs((1, D)), fs((1, D)),                           # norm2 gamma/beta
        fs((1, D)), fs((1, D)),                           # after_norm gamma/beta
    ]
    return pl.pallas_call(
        functools.partial(_encoder_layer_kernel, n_head=n_head,
                          add_pe=add_pe, final_ln=final_ln),
        grid=(B,),
        in_specs=in_specs,
        out_specs=pl.BlockSpec((1, T, D), lambda b: (b, 0, 0)),
        out_shape=jax.ShapeDtypeStruct((B, T, D), jnp.float32),
        compiler_params=pltpu.CompilerParams(dimension_semantics=("parallel",)),
    )(x, mask_f, pe,
      lp["wqkv"], lp["bqkv"], lp["wo"], lp["bo"],
      lp["w1"], lp["b1"], lp["w2"], lp["b2"],
      lp["g1"], lp["be1"], lp["g2"], lp["be2"],
      after_g, after_b)


# ------------------------------- JAX glue ----------------------------------

def _im2col(x, ksize=3, stride=2):
    """x: (B, H, W, C) -> patches (B, Ho, Wo, C*k*k) flattened (c_in, ki, kj)."""
    B, H, W, C = x.shape
    Ho = (H - ksize) // stride + 1
    Wo = (W - ksize) // stride + 1
    cols = []
    for ki in range(ksize):
        for kj in range(ksize):
            cols.append(x[:, ki:ki + stride * (Ho - 1) + 1:stride,
                          kj:kj + stride * (Wo - 1) + 1:stride, :])
    p = jnp.stack(cols, axis=-1)                 # (B, Ho, Wo, C, k*k)
    return p.reshape(B, Ho, Wo, C * ksize * ksize), Ho, Wo


def positional_encoding(T, D):
    pos = jnp.arange(T, dtype=jnp.float32)[:, None]
    div = jnp.exp(jnp.arange(0, D, 2, dtype=jnp.float32) * (-math.log(10000.0) / D))
    pe = jnp.zeros((T, D), jnp.float32)
    pe = pe.at[:, 0::2].set(jnp.sin(pos * div))
    pe = pe.at[:, 1::2].set(jnp.cos(pos * div))
    return pe


def _pack_layer(lp):
    """Host-side packing: fused QKV weights, bf16 weight tiles, f32 biases."""
    return {
        "wqkv": jnp.concatenate([lp["wq"], lp["wk"], lp["wv"]],
                                axis=1).astype(jnp.bfloat16),
        "bqkv": jnp.concatenate([lp["bq"], lp["bk"], lp["bv"]], axis=1),
        "wo": lp["wo"].astype(jnp.bfloat16), "bo": lp["bo"],
        "w1": lp["w1"].astype(jnp.bfloat16), "b1": lp["b1"],
        "w2": lp["w2"].astype(jnp.bfloat16), "b2": lp["b2"],
        "g1": lp["g1"], "be1": lp["be1"],
        "g2": lp["g2"], "be2": lp["be2"],
    }


def init_params(key, idim, D, U, num_blocks):
    def nrm(k, shape, s=0.05):
        return jax.random.normal(k, shape, jnp.float32) * s

    ks = jax.random.split(key, 8 + num_blocks)
    f1 = (idim - 3) // 2 + 1
    f2 = (f1 - 3) // 2 + 1
    p = {
        "conv1_w": nrm(ks[0], (D, 1, 3, 3)),     # Conv2d(1, D, 3, 2)
        "conv1_b": nrm(ks[1], (D,)),
        "conv2_w": nrm(ks[2], (D, D, 3, 3)),     # Conv2d(D, D, 3, 2)
        "conv2_b": nrm(ks[3], (D,)),
        "embed_w": nrm(ks[4], (D * f2, D)),      # Linear(D*f2, D) stored (in, out)
        "embed_b": nrm(ks[5], (D,)),
        "after_g": jnp.ones((1, D), jnp.float32),
        "after_b": jnp.zeros((1, D), jnp.float32),
    }
    layers = []
    for i in range(num_blocks):
        lk = jax.random.split(ks[8 + i], 12)
        layers.append({
            "wq": nrm(lk[0], (D, D)), "bq": nrm(lk[1], (1, D)),
            "wk": nrm(lk[2], (D, D)), "bk": nrm(lk[3], (1, D)),
            "wv": nrm(lk[4], (D, D)), "bv": nrm(lk[5], (1, D)),
            "wo": nrm(lk[6], (D, D)), "bo": nrm(lk[7], (1, D)),
            "w1": nrm(lk[8], (D, U)), "b1": nrm(lk[9], (1, U)),
            "w2": nrm(lk[10], (U, D)), "b2": nrm(lk[11], (1, D)),
            "g1": jnp.ones((1, D), jnp.float32), "be1": jnp.zeros((1, D), jnp.float32),
            "g2": jnp.ones((1, D), jnp.float32), "be2": jnp.zeros((1, D), jnp.float32),
        })
    p["layers"] = layers
    return p


def encoder_forward(params, xs, masks, n_head):
    """xs: (B, T, idim) float32, masks: (B, 1, T) bool -> ((B,T',D), (B,1,T'))."""
    B, T, idim = xs.shape
    D = params["conv1_w"].shape[0]
    sqrt_d = math.sqrt(D)

    # ---- Conv2dSubsampling: unsqueeze channel, two Conv2d(k=3, s=2) + ReLU ----
    x = xs[..., None]                                    # (B, T, idim, 1) NHWC
    p1, T1, F1 = _im2col(x)
    w1c = params["conv1_w"].reshape(D, 1 * 9).T          # (9, D)
    y1 = pallas_linear(p1.reshape(B * T1 * F1, -1), w1c, params["conv1_b"], relu=True)
    y1 = y1.reshape(B, T1, F1, D)

    p2, T2, F2 = _im2col(y1)
    w2c = params["conv2_w"].reshape(D, D * 9).T          # (D*9, D)
    y2 = pallas_linear(p2.reshape(B * T2 * F2, -1), w2c, params["conv2_b"], relu=True)
    y2 = y2.reshape(B, T2, F2, D)

    # x.transpose(1, 2).view(b, t, c * f)  -> flatten in (channel, freq) order
    y2 = jnp.transpose(y2, (0, 1, 3, 2)).reshape(B, T2, D * F2)

    # Linear(D*F2, D) with the PositionalEncoding xscale=sqrt(D) folded into
    # the weights/bias; the PE add itself is fused into the first layer kernel.
    h = pallas_linear(y2.reshape(B * T2, D * F2),
                      params["embed_w"] * sqrt_d,
                      params["embed_b"] * sqrt_d)
    h = h.reshape(B, T2, D)

    # mask subsampling: x_mask[:, :, :-2:2][:, :, :-2:2]
    m = masks[:, :, :-2:2][:, :, :-2:2]
    m_f = m.astype(jnp.float32)
    pe = positional_encoding(T2, D)[None]                # (1, T2, D)

    # ---- encoder layers (PE fused into first, after_norm into last) ----
    n_layers = len(params["layers"])
    for i, lp in enumerate(params["layers"]):
        packed = _pack_layer(lp)
        h = pallas_encoder_layer(h, m_f, pe, packed,
                                 params["after_g"], params["after_b"],
                                 n_head,
                                 add_pe=(i == 0),
                                 final_ln=(i == n_layers - 1))
    return h, m


# --------------------------------- main -------------------------------------

if __name__ == "__main__":
    key = jax.random.PRNGKey(0)
    kx, kp = jax.random.split(key)

    # small shapes consistent with the module
    B, T, idim = 2, 16, 16
    attention_dim, attention_heads, linear_units, num_blocks = 32, 4, 64, 2

    xs = jax.random.normal(kx, (B, T, idim), jnp.float32)
    masks = jnp.ones((B, 1, T), dtype=bool)

    params = init_params(kp, idim, attention_dim, linear_units, num_blocks)

    ys, out_masks = encoder_forward(params, xs, masks, attention_heads)
    jax.block_until_ready(ys)

    assert ys.shape == (B, 3, attention_dim) and out_masks.shape == (B, 1, 3)
    print("KERNEL_OK")
</pallas_src>

<mosaic_0001>
module attributes {stable_mosaic.version = 11 : i64} {
  func.func @_linear_kernel(%arg0: i32, %arg1: memref<98x9xf32, #tpu.memory_space<vmem>>, %arg2: memref<9x32xbf16, #tpu.memory_space<vmem>>, %arg3: memref<1x32xf32, #tpu.memory_space<vmem>>, %arg4: memref<98x32xf32, #tpu.memory_space<vmem>>) attributes {dimension_semantics = [#tpu.dimension_semantics<parallel>], iteration_bounds = array<i64: 1>, scalar_prefetch = 0 : i64, scratch_operands = 0 : i64, tpu.core_type = #tpu.core_type<tc>, window_params = [{transform_indices = @transform_0, window_bounds = array<i64: 98, 9>}, {pipeline_mode = #tpu.pipeline_mode<synchronous>, transform_indices = @transform_1, window_bounds = array<i64: 9, 32>}, {pipeline_mode = #tpu.pipeline_mode<synchronous>, transform_indices = @transform_2, window_bounds = array<i64: 1, 32>}, {transform_indices = @transform_3, window_bounds = array<i64: 98, 32>}]} {
    %c0 = arith.constant 0 : index
    %c0_0 = arith.constant 0 : index
    %0 = vector.load %arg1[%c0, %c0_0] : memref<98x9xf32, #tpu.memory_space<vmem>>, vector<98x9xf32>
    %1 = arith.truncf %0 : vector<98x9xf32> to vector<98x9xbf16>
    %c0_1 = arith.constant 0 : index
    %c0_2 = arith.constant 0 : index
    %2 = vector.load %arg2[%c0_1, %c0_2] : memref<9x32xbf16, #tpu.memory_space<vmem>>, vector<9x32xbf16>
    %cst = arith.constant dense<0.000000e+00> : vector<98x32xf32>
    %3 = tpu.matmul %1, %2, %cst {dimension_numbers = #tpu.dot_dimension_numbers<[1], [0], [0], [1], [0, 0, 1, 1], [], []>} : vector<98x9xbf16>, vector<9x32xbf16>, vector<98x32xf32> -> vector<98x32xf32>
    %c0_3 = arith.constant 0 : index
    %c0_4 = arith.constant 0 : index
    %4 = vector.load %arg3[%c0_3, %c0_4] : memref<1x32xf32, #tpu.memory_space<vmem>>, vector<1x32xf32>
    %5 = vector.broadcast %4 : vector<1x32xf32> to vector<98x32xf32>
    %6 = arith.addf %3, %5 : vector<98x32xf32>
    %cst_5 = arith.constant 0.000000e+00 : f32
    %7 = vector.broadcast %cst_5 : f32 to vector<98x32xf32>
    %8 = arith.maximumf %6, %7 : vector<98x32xf32>
    %c0_6 = arith.constant 0 : index
    %c0_7 = arith.constant 0 : index
    %9 = vector.load %arg4[%c0_6, %c0_7] : memref<98x32xf32, #tpu.memory_space<vmem>>, vector<98x32xf32>
    tpu.vector_store %arg4[%c0_6, %c0_7], %8 {strides = array<i32>} : memref<98x32xf32, #tpu.memory_space<vmem>>, vector<98x32xf32>,
    return
  }
  func.func @transform_0(%arg0: i32) -> (i32, i32) {
    %c0_i32 = arith.constant 0 : i32
    %c0_i32_0 = arith.constant 0 : i32
    return %arg0, %c0_i32 : i32, i32
  }
  func.func @transform_1(%arg0: i32) -> (i32, i32) {
    %c0_i32 = arith.constant 0 : i32
    %c0_i32_0 = arith.constant 0 : i32
    %c0_i32_1 = arith.constant 0 : i32
    return %c0_i32, %c0_i32_0 : i32, i32
  }
  func.func @transform_2(%arg0: i32) -> (i32, i32) {
    %c0_i32 = arith.constant 0 : i32
    %c0_i32_0 = arith.constant 0 : i32
    %c0_i32_1 = arith.constant 0 : i32
    return %c0_i32, %c0_i32_0 : i32, i32
  }
  func.func @transform_3(%arg0: i32) -> (i32, i32) {
    %c0_i32 = arith.constant 0 : i32
    %c0_i32_0 = arith.constant 0 : i32
    return %arg0, %c0_i32 : i32, i32
  }
}

</mosaic_0001>

<bundles_post_ra>
// kernel: tpu_custom_call.1
= control target key start
LH: loop header
LB: loop body
LE: loop exit
PB: predicated region body
PF: predicated region fallthrough
CT: control target
= control target key end

     0   :  { %vm68_vm0 = vcmask 1043456   ;;  %vm69_vm1 = vcmask 1044480   ;;  %v167_v2 = vmov 65535   ;;  %vm46_vm2 = vcmask 72704   ;;  %s294_s1 = inlined_call_operand.vmem [shape: bf16[9,32], index: 1, kind: input, shape index: {}]   ;;  %s295_s0 = inlined_call_operand.vmem [shape: f32[98,9], index: 0, kind: input, shape index: {}]   ;;  %s296_s2 = inlined_call_operand.vmem [shape: f32[1,32], index: 2, kind: input, shape index: {}]   ;;  %s297_s3 = inlined_call_operand.vmem [shape: f32[98,32], index: 3, kind: output, shape index: {}]  }
   0x1   :  { %v152_v0 = vld [vmem:[%s294_s1] sm:$0xf]  ;;  %v161_v1 = vld [vmem:[%s294_s1] sm:$0x10]  ;;  %v70_v3 = vsel %vm68_vm0, 4294967295, %v167_v2  ;;  %v16_v7 = vld [vmem:[%s295_s0 + $0x8] sm:$0xff] }
   0x2   :  { %v15_v4 = vld [vmem:[%s295_s0] sm:$0xff]  ;;  %v153_v5 = vor.u32 %v161_v1, %v152_v0  ;;  %v71_v6 = vsel %vm69_vm1, %v70_v3, 0  ;;  %v20_v9 = vld [vmem:[%s295_s0 + $0x28] sm:$0xff]  ;;  %v25_v10 = vld [vmem:[%s295_s0 + $0x50] sm:$0xff]  ;;  %vm131_vm3 = vcmask 261120   ;;  %vm144_vm4 = vcmask 254976  }
   0x3   :  { %v19_v8 = vld [vmem:[%s295_s0 + $0x20] sm:$0xff]  ;;  %v26_v11 = vld [vmem:[%s295_s0 + $0x58] sm:$0xff]  ;;  %v24_v14 = vld [vmem:[%s295_s0 + $0x48] sm:$0xff]  ;;  %v28_v15 = vpack.c.bf16 %v16_v7, %v15_v4 }
   0x4   :  { %v23_v12 = vld [vmem:[%s295_s0 + $0x40] sm:$0xff]  ;;  %v73_v13 = vand.u32 %v153_v5, %v71_v6  ;;  %v30_v16 = vpack.c.bf16 %v20_v9, %v19_v8  ;;  %v33_v17 = vpack.c.bf16 %v26_v11, %v25_v10  ;;  %v17_v19 = vld [vmem:[%s295_s0 + $0x10] sm:$0xff]  ;;  %v18_v20 = vld [vmem:[%s295_s0 + $0x18] sm:$0xff] }
   0x5   :  { %v32_v18 = vpack.c.bf16 %v24_v14, %v23_v12  ;;  %v21_v21 = vld [vmem:[%s295_s0 + $0x30] sm:$0xff]  ;;  %v22_v22 = vld [vmem:[%s295_s0 + $0x38] sm:$0xff]  ;;  %v27_v23 = vld [vmem:[%s295_s0 + $0x60] sm:$0x3]  ;;  %v29_v24 = vpack.c.bf16 %v18_v20, %v17_v19 }
   0x6   :  { %82 = vmatpush.bf16.msra.mxu0 %v73_v13  ;;  %162 = vmatpush.bf16.msra.mxu1 %v73_v13  ;;  %v31_v25 = vpack.c.bf16 %v22_v22, %v21_v21  ;;  %v34_v26 = vpack.c.bf16 %v27_v23, %v27_v23  ;;  %v166_v27 = vld [vmem:[%s296_s2] ss:$0 sm:$0xff] }
   0x7   :  { %164 = vmatpush.bf16.msra.mxu3 %v73_v13  ;;  %163 = vmatpush.bf16.msra.mxu2 %v73_v13 }
   0x9   :  { %154 = vmatmul.msk.bf16.vlgmr.msra.gmra.mxu0 %vm46_vm2, %v28_v15  ;;  %156 = vmatmul.msk.bf16.vlgmr.msra.gmra.mxu1 %vm46_vm2, %v30_v16 }
   0xa   :  { %159 = vmatmul.msk.bf16.vlgmr.msra.gmra.mxu3 %vm46_vm2, %v33_v17  ;;  %158 = vmatmul.msk.bf16.vlgmr.msra.gmra.mxu2 %vm46_vm2, %v32_v18 }
  0x19   :  { %155 = vmatmul.msk.bf16.gmra.mxu0 %vm46_vm2, %v29_v24  ;;  %157 = vmatmul.msk.bf16.gmra.mxu1 %vm46_vm2, %v31_v25 }
  0x1a   :  { %160 = vmatmul.msk.bf16.gmra.mxu3 %vm46_vm2, %v34_v26 }
  0x86   :  { %v84_v28 = vpop.f32.mrf.mxu0  ;;  %v94_v29 = vpop.f32.mrf.mxu1 }
  0x87   :  { %v85_v30 = vadd.f32 %v166_v27, %v84_v28  ;;  %v95_v31 = vadd.f32 %v166_v27, %v94_v29 }
  0x89   :  { %v118_v32 = vmax.f32 %v85_v30, 0.0  ;;  %v122_v33 = vmax.f32 %v95_v31, 0.0 }
  0x8b   :  { %132 = vst.msk [vmem:[%s297_s3] sm:$0xff] %vm131_vm3, %v118_v32 }
  0x8c   :  { %136 = vst.msk [vmem:[%s297_s3 + $0x20] sm:$0xff] %vm131_vm3, %v122_v33 }
  0x8d   :  { %v109_v34 = vpop.f32.mrf.mxu3  ;;  %v104_v35 = vpop.f32.mrf.mxu2 }
  0x8e   :  { %v110_v36 = vadd.f32 %v166_v27, %v109_v34  ;;  %v86_v37 = vpop.f32.mrf.mxu0  ;;  %v96_v38 = vpop.f32.mrf.mxu1  ;;  %v105_v39 = vadd.f32 %v166_v27, %v104_v35 }
  0x8f   :  { %v87_v40 = vadd.f32 %v166_v27, %v86_v37  ;;  %v97_v41 = vadd.f32 %v166_v27, %v96_v38 }
  0x90   :  { %v128_v42 = vmax.f32 %v110_v36, 0.0  ;;  %v126_v45 = vmax.f32 %v105_v39, 0.0 }
  0x91   :  { %v119_v43 = vmax.f32 %v87_v40, 0.0  ;;  %v123_v44 = vmax.f32 %v97_v41, 0.0 }
  0x92   :  { %142 = vst.msk [vmem:[%s297_s3 + $0x50] sm:$0xff] %vm131_vm3, %v128_v42 }
  0x93   :  { %133 = vst.msk [vmem:[%s297_s3 + $0x8] sm:$0xff] %vm131_vm3, %v119_v43 }
  0x94   :  { %137 = vst.msk [vmem:[%s297_s3 + $0x28] sm:$0xff] %vm131_vm3, %v123_v44 }
  0x95   :  { %140 = vst.msk [vmem:[%s297_s3 + $0x40] sm:$0xff] %vm131_vm3, %v126_v45  ;;  %v111_v46 = vpop.f32.mrf.mxu3  ;;  %v106_v47 = vpop.f32.mrf.mxu2 }
  0x96   :  { %v112_v48 = vadd.f32 %v166_v27, %v111_v46  ;;  %v89_v49 = vpop.f32.mrf.mxu0  ;;  %v99_v50 = vpop.f32.mrf.mxu1  ;;  %v107_v51 = vadd.f32 %v166_v27, %v106_v47 }
  0x97   :  { %v90_v52 = vadd.f32 %v166_v27, %v89_v49  ;;  %v100_v53 = vadd.f32 %v166_v27, %v99_v50 }
  0x98   :  { %v129_v54 = vmax.f32 %v112_v48, 0.0  ;;  %v127_v57 = vmax.f32 %v107_v51, 0.0 }
  0x99   :  { %v120_v55 = vmax.f32 %v90_v52, 0.0  ;;  %v124_v56 = vmax.f32 %v100_v53, 0.0 }
  0x9a   :  { %143 = vst.msk [vmem:[%s297_s3 + $0x58] sm:$0xff] %vm131_vm3, %v129_v54 }
  0x9b   :  { %134 = vst.msk [vmem:[%s297_s3 + $0x10] sm:$0xff] %vm131_vm3, %v120_v55 }
  0x9c   :  { %138 = vst.msk [vmem:[%s297_s3 + $0x30] sm:$0xff] %vm131_vm3, %v124_v56 }
  0x9d   :  { %141 = vst.msk [vmem:[%s297_s3 + $0x48] sm:$0xff] %vm131_vm3, %v127_v57  ;;  %v114_v58 = vpop.f32.mrf.mxu3 }
  0x9e   :  { %v115_v59 = vadd.f32 %v166_v27, %v114_v58  ;;  %v91_v60 = vpop.f32.mrf.mxu0  ;;  %v101_v61 = vpop.f32.mrf.mxu1 }
  0x9f   :  { %v92_v62 = vadd.f32 %v166_v27, %v91_v60  ;;  %v102_v63 = vadd.f32 %v166_v27, %v101_v61 }
  0xa0   :  { %v130_v0 = vmax.f32 %v115_v59, 0.0 }
  0xa1   :  { %v121_v1 = vmax.f32 %v92_v62, 0.0  ;;  %v125_v2 = vmax.f32 %v102_v63, 0.0 }
  0xa2   :  { %145 = vst.msk [vmem:[%s297_s3 + $0x60] sm:$0x3] %vm144_vm4, %v130_v0 }
  0xa3   :  { %135 = vst.msk [vmem:[%s297_s3 + $0x18] sm:$0xff] %vm131_vm3, %v121_v1 }
  0xa4   :  { %139 = vst.msk [vmem:[%s297_s3 + $0x38] sm:$0xff] %vm131_vm3, %v125_v2 }
  0xa5   :  { %v116_v3 = vpop.f32.mrf.mxu3 }

</bundles_post_ra>
